<compile_context>
chip_gen: v6e
topology: v6e:2x2x1
jax: 0.10.0
libtpu: 0.0.40
codegen_flags: <defaults>
</compile_context>

<pallas_src>
import functools

import jax
import jax.numpy as jnp
import numpy as np
from jax import lax
from jax.experimental import pallas as pl
from jax.experimental.pallas import tpu as pltpu


def _focal_loss_kernel(logits_ref, labels_ref, out_ref, *, gamma, eps,
                       onehot_eps, ignore_index, alpha):
    x = logits_ref[...].astype(jnp.float32)             # (C, TP)
    labels = labels_ref[...]                             # (1, TP) int32

    # softmax over the class (sublane) axis + eps, matching F.softmax + eps.
    m = jnp.max(x, axis=0, keepdims=True)                # (1, TP)
    e = jnp.exp(x - m)                                    # EUP
    s = jnp.sum(e, axis=0, keepdims=True)                 # (1, TP)
    soft = e / s + eps                                     # (C, TP)

    base = 1.0 - soft
    if float(gamma) == 2.0:
        weight = base * base                               # exact, avoids generic pow
    else:
        weight = jnp.power(base, gamma)
    focal = -weight * jnp.log(soft)                        # (C, TP)

    # one-hot selection (target_copy: ignored pixels remapped to class 0).
    cls = lax.broadcasted_iota(jnp.int32, focal.shape, 0)      # (C, TP)
    valid = labels != ignore_index                              # (1, TP) bool
    labels_copy = jnp.where(valid, labels, 0)                   # (1, TP)
    onehot = (labels_copy == cls).astype(jnp.float32)           # (C, TP), implicit bcast

    sel = jnp.sum(onehot * focal, axis=0, keepdims=True)        # focal[target]
    tot = jnp.sum(focal, axis=0, keepdims=True)                 # +1e-6 smear of one_hot
    loss = sel + onehot_eps * tot                               # (1, TP)

    ignore_mask = valid.astype(jnp.float32)                     # (1, TP)

    if alpha is not None:
        # alpha is a small trace-time Python tuple; build the per-pixel alpha
        # with scalar selects instead of capturing an f32[C] constant.
        alpha_pix = jnp.zeros_like(ignore_mask)
        for idx, a in enumerate(alpha):
            alpha_pix = jnp.where(labels_copy == idx, jnp.float32(a), alpha_pix)
        out_ref[...] = loss * ignore_mask * alpha_pix
    else:
        out_ref[...] = loss * ignore_mask


def focal_loss_pallas(logits, target, alpha=(), gamma=2.0, reduction="none",
                      ignore_index=9999, eps=1e-8, tile_p=512):
    """logits: (N, C, H, W) float; target: (N, H, W) int (0..C-1 or ignore_index)."""
    N, C, H, W = logits.shape
    P = N * H * W

    # class-major, pixels on the lane axis (same pixel order as target.reshape(-1))
    x_cp = jnp.transpose(logits, (1, 0, 2, 3)).reshape(C, P).astype(jnp.float32)
    labels_row = target.reshape(1, P).astype(jnp.int32)

    # pad the pixel axis to a multiple of the lane tile; pads are "ignored" pixels.
    P_pad = ((P + tile_p - 1) // tile_p) * tile_p
    if P_pad != P:
        x_cp = jnp.pad(x_cp, ((0, 0), (0, P_pad - P)))
        labels_row = jnp.pad(labels_row, ((0, 0), (0, P_pad - P)),
                             constant_values=ignore_index)

    alpha_tuple = tuple(float(a) for a in alpha) if len(alpha) else None
    if alpha_tuple is not None:
        assert len(alpha_tuple) == C, "alpha does not contain a weight per class"

    kernel = functools.partial(
        _focal_loss_kernel,
        gamma=float(gamma), eps=float(eps), onehot_eps=1e-6,
        ignore_index=int(ignore_index), alpha=alpha_tuple)

    grid = (P_pad // tile_p,)
    out = pl.pallas_call(
        kernel,
        out_shape=jax.ShapeDtypeStruct((1, P_pad), jnp.float32),
        grid_spec=pltpu.PrefetchScalarGridSpec(
            num_scalar_prefetch=0,
            grid=grid,
            in_specs=[
                pl.BlockSpec((C, tile_p), lambda i: (0, i)),
                pl.BlockSpec((1, tile_p), lambda i: (0, i)),
            ],
            out_specs=pl.BlockSpec((1, tile_p), lambda i: (0, i)),
        ),
        compiler_params=pltpu.CompilerParams(
            dimension_semantics=("parallel",),
            vmem_limit_bytes=32 * 1024 * 1024,
        ),
    )(x_cp, labels_row)

    loss_none = out[0, :P].reshape(N, H, W)
    if reduction == "none":
        return loss_none
    elif reduction == "sum":
        return jnp.sum(loss_none)
    elif reduction == "mean":
        num_valid = jnp.count_nonzero(target != ignore_index).astype(jnp.float32)
        return jnp.sum(loss_none) / num_valid
    else:
        raise NotImplementedError("Invalid reduction mode: {}".format(reduction))


def _focal_loss_ref(logits, target, alpha=(), gamma=2.0, reduction="none",
                    ignore_index=9999, eps=1e-8):
    """Pure numpy (float64) reference mirroring the torch implementation."""
    x = np.asarray(logits, dtype=np.float64)
    t = np.asarray(target)
    N, C, H, W = x.shape
    ignore_mask = np.where(t == ignore_index, 0.0, 1.0)
    t_copy = np.where(t == ignore_index, 0, t).astype(np.int64)
    num_valid = np.count_nonzero(ignore_mask)

    if len(alpha) == 0:
        alpha_mask = np.ones_like(ignore_mask)
    else:
        alpha_mask = np.zeros(t.shape, dtype=np.float64)
        for idx, a in enumerate(alpha):
            alpha_mask[t == idx] = a

    xm = x - x.max(axis=1, keepdims=True)
    soft = np.exp(xm) / np.exp(xm).sum(axis=1, keepdims=True) + eps

    onehot = np.zeros_like(x)
    nn_, hh, ww = np.meshgrid(np.arange(N), np.arange(H), np.arange(W), indexing="ij")
    onehot[nn_, t_copy, hh, ww] = 1.0
    onehot = onehot + 1e-6

    weight = np.power(1.0 - soft, gamma)
    focal = -weight * np.log(soft)
    loss_tmp = np.sum(onehot * focal, axis=1) * ignore_mask * alpha_mask

    if reduction == "none":
        return loss_tmp
    elif reduction == "mean":
        return loss_tmp.sum() / num_valid
    elif reduction == "sum":
        return loss_tmp.sum()
    raise NotImplementedError(reduction)


if __name__ == "__main__":
    key = jax.random.PRNGKey(0)
    k1, k2, k3 = jax.random.split(key, 3)
    N, C, H, W = 2, 4, 16, 16
    IGNORE = 9999

    logits = jax.random.normal(k1, (N, C, H, W), dtype=jnp.float32)
    target = jax.random.randint(k2, (N, H, W), 0, C, dtype=jnp.int32)
    # sprinkle some ignored pixels to exercise the ignore_index path
    drop = jax.random.bernoulli(k3, 0.1, (N, H, W))
    target = jnp.where(drop, IGNORE, target)

    # case 1: defaults (no alpha, reduction='none')
    loss_none = focal_loss_pallas(logits, target, alpha=(), gamma=2.0,
                                  reduction="none", ignore_index=IGNORE)
    loss_none = jax.block_until_ready(loss_none)
    ref_none = _focal_loss_ref(np.asarray(logits), np.asarray(target),
                               alpha=(), gamma=2.0, reduction="none",
                               ignore_index=IGNORE)
    assert np.allclose(np.asarray(loss_none), ref_none, rtol=1e-4, atol=1e-5)

    # case 2: per-class alpha weights, reduction='mean'
    alpha = (0.25, 0.5, 0.75, 1.0)
    loss_mean = focal_loss_pallas(logits, target, alpha=alpha, gamma=2.0,
                                  reduction="mean", ignore_index=IGNORE)
    loss_mean = jax.block_until_ready(loss_mean)
    ref_mean = _focal_loss_ref(np.asarray(logits), np.asarray(target),
                               alpha=alpha, gamma=2.0, reduction="mean",
                               ignore_index=IGNORE)
    assert np.allclose(float(loss_mean), float(ref_mean), rtol=1e-4, atol=1e-5), (
        float(loss_mean), float(ref_mean))

    # case 3: reduction='sum', no alpha
    loss_sum = focal_loss_pallas(logits, target, alpha=(), gamma=2.0,
                                 reduction="sum", ignore_index=IGNORE)
    loss_sum = jax.block_until_ready(loss_sum)
    ref_sum = _focal_loss_ref(np.asarray(logits), np.asarray(target),
                              alpha=(), gamma=2.0, reduction="sum",
                              ignore_index=IGNORE)
    assert np.allclose(float(loss_sum), float(ref_sum), rtol=1e-4, atol=1e-5), (
        float(loss_sum), float(ref_sum))

    print("KERNEL_OK")
</pallas_src>

<mosaic_0001>
module attributes {stable_mosaic.version = 11 : i64} {
  func.func @_focal_loss_kernel(%arg0: i32, %arg1: memref<4x512xf32, #tpu.memory_space<vmem>>, %arg2: memref<1x512xi32, #tpu.memory_space<vmem>>, %arg3: memref<1x512xf32, #tpu.memory_space<vmem>>) attributes {dimension_semantics = [#tpu.dimension_semantics<parallel>], iteration_bounds = array<i64: 1>, scalar_prefetch = 0 : i64, scratch_operands = 0 : i64, tpu.core_type = #tpu.core_type<tc>, window_params = [{transform_indices = @transform_0, window_bounds = array<i64: 4, 512>}, {transform_indices = @transform_1, window_bounds = array<i64: 1, 512>}, {transform_indices = @transform_2, window_bounds = array<i64: 1, 512>}]} {
    %c0 = arith.constant 0 : index
    %c0_0 = arith.constant 0 : index
    %0 = vector.load %arg1[%c0, %c0_0] : memref<4x512xf32, #tpu.memory_space<vmem>>, vector<4x512xf32>
    %c0_1 = arith.constant 0 : index
    %c0_2 = arith.constant 0 : index
    %1 = vector.load %arg2[%c0_1, %c0_2] : memref<1x512xi32, #tpu.memory_space<vmem>>, vector<1x512xi32>
    %cst = arith.constant dense<0xFF800000> : vector<512xf32>
    %2 = vector.multi_reduction <maximumf>, %0, %cst [0] : vector<4x512xf32> to vector<512xf32>
    %3 = vector.shape_cast %2 : vector<512xf32> to vector<1x512xf32>
    %4 = vector.broadcast %3 : vector<1x512xf32> to vector<4x512xf32>
    %5 = arith.subf %0, %4 : vector<4x512xf32>
    %6 = math.exp %5 : vector<4x512xf32>
    %cst_3 = arith.constant dense<0.000000e+00> : vector<512xf32>
    %7 = vector.multi_reduction <add>, %6, %cst_3 [0] : vector<4x512xf32> to vector<512xf32>
    %8 = vector.shape_cast %7 : vector<512xf32> to vector<1x512xf32>
    %9 = vector.broadcast %8 : vector<1x512xf32> to vector<4x512xf32>
    %10 = arith.divf %6, %9 : vector<4x512xf32>
    %cst_4 = arith.constant 9.99999993E-9 : f32
    %11 = vector.broadcast %cst_4 : f32 to vector<4x512xf32>
    %12 = arith.addf %10, %11 : vector<4x512xf32>
    %cst_5 = arith.constant 1.000000e+00 : f32
    %13 = vector.broadcast %cst_5 : f32 to vector<4x512xf32>
    %14 = arith.subf %13, %12 : vector<4x512xf32>
    %15 = arith.mulf %14, %14 : vector<4x512xf32>
    %cst_6 = arith.constant 0.000000e+00 : f32
    %16 = vector.broadcast %cst_6 : f32 to vector<4x512xf32>
    %17 = arith.subf %16, %15 : vector<4x512xf32>
    %18 = math.log %12 : vector<4x512xf32>
    %19 = arith.mulf %17, %18 : vector<4x512xf32>
    %20 = tpu.iota {dimensions = array<i32: 0>} : vector<4x512xi32>
    %c9999_i32 = arith.constant 9999 : i32
    %21 = vector.broadcast %c9999_i32 : i32 to vector<1x512xi32>
    %22 = arith.cmpi ne, %1, %21 : vector<1x512xi32>
    %c0_i32 = arith.constant 0 : i32
    %23 = vector.broadcast %c0_i32 : i32 to vector<1x512xi32>
    %24 = arith.select %22, %1, %23 : vector<1x512xi1>, vector<1x512xi32>
    %25 = vector.broadcast %24 : vector<1x512xi32> to vector<4x512xi32>
    %26 = arith.cmpi eq, %25, %20 : vector<4x512xi32>
    %27 = arith.extui %26 : vector<4x512xi1> to vector<4x512xi32>
    %28 = arith.sitofp %27 : vector<4x512xi32> to vector<4x512xf32>
    %29 = arith.mulf %28, %19 : vector<4x512xf32>
    %cst_7 = arith.constant dense<0.000000e+00> : vector<512xf32>
    %30 = vector.multi_reduction <add>, %29, %cst_7 [0] : vector<4x512xf32> to vector<512xf32>
    %31 = vector.shape_cast %30 : vector<512xf32> to vector<1x512xf32>
    %cst_8 = arith.constant dense<0.000000e+00> : vector<512xf32>
    %32 = vector.multi_reduction <add>, %19, %cst_8 [0] : vector<4x512xf32> to vector<512xf32>
    %33 = vector.shape_cast %32 : vector<512xf32> to vector<1x512xf32>
    %cst_9 = arith.constant 9.99999997E-7 : f32
    %34 = vector.broadcast %cst_9 : f32 to vector<1x512xf32>
    %35 = arith.mulf %34, %33 : vector<1x512xf32>
    %36 = arith.addf %31, %35 : vector<1x512xf32>
    %37 = arith.extui %22 : vector<1x512xi1> to vector<1x512xi32>
    %38 = arith.sitofp %37 : vector<1x512xi32> to vector<1x512xf32>
    %39 = arith.mulf %36, %38 : vector<1x512xf32>
    %c0_10 = arith.constant 0 : index
    %c0_11 = arith.constant 0 : index
    %40 = vector.load %arg3[%c0_10, %c0_11] : memref<1x512xf32, #tpu.memory_space<vmem>>, vector<1x512xf32>
    tpu.vector_store %arg3[%c0_10, %c0_11], %39 {strides = array<i32>} : memref<1x512xf32, #tpu.memory_space<vmem>>, vector<1x512xf32>,
    return
  }
  func.func @transform_0(%arg0: i32) -> (i32, i32) {
    %c0_i32 = arith.constant 0 : i32
    %c0_i32_0 = arith.constant 0 : i32
    return %c0_i32, %arg0 : i32, i32
  }
  func.func @transform_1(%arg0: i32) -> (i32, i32) {
    %c0_i32 = arith.constant 0 : i32
    %c0_i32_0 = arith.constant 0 : i32
    return %c0_i32, %arg0 : i32, i32
  }
  func.func @transform_2(%arg0: i32) -> (i32, i32) {
    %c0_i32 = arith.constant 0 : i32
    %c0_i32_0 = arith.constant 0 : i32
    return %c0_i32, %arg0 : i32, i32
  }
}

</mosaic_0001>

<bundles_post_ra>
// kernel: tpu_custom_call.1
= control target key start
LH: loop header
LB: loop body
LE: loop exit
PB: predicated region body
PF: predicated region fallthrough
CT: control target
= control target key end

     0   :  { %7 = vsyncpa [#allocation3], 0  ;;  %s506_s0 = inlined_call_operand.hbm [shape: f32[4,512], index: 0, kind: input, shape index: {}]   ;;  %s507_s1 = inlined_call_operand.hbm [shape: s32[1,512], index: 1, kind: input, shape index: {}]   ;;  %s508_s2 = inlined_call_operand.hbm [shape: f32[1,512], index: 2, kind: output, shape index: {}]  }
   0x1   :  { %8 = vsyncpa [#allocation6], 0 }
   0x2   :  { %9 = vsyncpa [#allocation4], 0  ;;  %s421_s9 = smov [#allocation2]   ;;  %s422_s11 = smov [#allocation5]  }
   0x3   :  { %s16_s10 = sshll.u32 %s421_s9, 4  ;;  %s26_s12 = sshll.u32 %s422_s11, 4  ;;  %s17_s10 = int_to_ptr.vmem [resolvable:$true] %s16_s10  ;;  %s27_s12 = int_to_ptr.vmem [resolvable:$true] %s26_s12 }
   0x4   :  { %s363_s13 = scalar_lea.vmem %s17_s10, 256  ;;  %p368_p1 = scmp.lt.s32.totalorder %s17_s10, %s17_s10 }
   0x5   :  { %p364_p0 = scmp.ne.s32.totalorder %s17_s10, %s363_s13  ;;  %p369_p2 = scmp.lt.s32.totalorder %s363_s13, %s363_s13 }
   0x7   :  { %p370_p3 = por %p369_p2, %p368_p1 }
   0x9   :  { %p371_p4 = pnand %p370_p3, %p364_p0 }
   0xb   :  { %374 = shalt.err (!%p371_p4)
}
   0xc   :  { %19 = dma.hbm_to_vmem [thread:$0]  %s506_s0, 256, %s17_s10, [#allocation3]  }
   0xd   :  { %s383_s16 = scalar_lea.vmem %s27_s12, 64  ;;  %p388_p6 = scmp.lt.s32.totalorder %s27_s12, %s27_s12 }
   0xe   :  { %p384_p5 = scmp.ne.s32.totalorder %s27_s12, %s383_s16  ;;  %p389_p7 = scmp.lt.s32.totalorder %s383_s16, %s383_s16 }
  0x10   :  { %p390_p8 = por %p389_p7, %p388_p6 }
  0x12   :  { %p391_p9 = pnand %p390_p8, %p384_p5 }
  0x14   :  { %394 = shalt.err (!%p391_p9)
}
  0x15   :  { %29 = dma.hbm_to_vmem [thread:$0]  %s507_s1, 64, %s27_s12, [#allocation6]  }
  0x16   :  { %415 = dma.done.wait [#allocation3], 256  }
  0x17   :  { %416 = vsyncadd [#allocation3], 4294967040 }
  0x18   :  { %417 = dma.done.wait [#allocation6], 64  }
  0x19   :  { %418 = vsyncadd [#allocation6], 4294967232  ;;  %vm45_vm0 = vcmask 1043456   ;;  %v36_v0 = vld [vmem:[#allocation2] sm:$0xff]  ;;  %v37_v1 = vld [vmem:[#allocation2 + $0x8] sm:$0xff]  ;;  %s425_s0 = smov [#allocation7]  }
  0x1a   :  { %v41_v2 = vcombine.high %v36_v0, %v36_v0  ;;  %v42_v3 = vcombine.high %v37_v1, %v37_v1  ;;  %v46_v4 = vsel %vm45_vm0, %v36_v0, -inf  ;;  %v60_v5 = vsel %vm45_vm0, %v37_v1, -inf  ;;  %s321_s1 = sshll.u32 %s425_s0, 4  ;;  %s322_s1 = int_to_ptr.vmem [resolvable:$true] %s321_s1 }
  0x1b   :  { %v47_v6 = vrot.slane %v46_v4, 4  ;;  %v61_v7 = vrot.slane %v60_v5, 4  ;;  %s395_s19 = scalar_lea.vmem %s322_s1, 64  ;;  %p400_p11 = scmp.lt.s32.totalorder %s322_s1, %s322_s1 }
  0x1c   :  { %v53_v8 = vsel %vm45_vm0, %v41_v2, -inf  ;;  %v67_v9 = vsel %vm45_vm0, %v42_v3, -inf  ;;  %p396_p10 = scmp.ne.s32.totalorder %s322_s1, %s395_s19  ;;  %p401_p12 = scmp.lt.s32.totalorder %s395_s19, %s395_s19 }
  0x1d   :  { %v48_v10 = vmax.f32 %v46_v4, %v47_v6  ;;  %v54_v11 = vrot.slane %v53_v8, 4  ;;  %v62_v12 = vmax.f32 %v60_v5, %v61_v7  ;;  %v68_v13 = vrot.slane %v67_v9, 4 }
  0x1e   :  { %p402_p13 = por %p401_p12, %p400_p11 }
  0x1f   :  { %v49_v14 = vrot.slane %v48_v10, 2  ;;  %v55_v15 = vmax.f32 %v53_v8, %v54_v11  ;;  %v63_v16 = vrot.slane %v62_v12, 2  ;;  %v69_v17 = vmax.f32 %v67_v9, %v68_v13 }
  0x20   :  { %v148_v11 = vlaneseq  ;;  %p403_p0 = pnand %p402_p13, %p396_p10 }
  0x21   :  { %v50_v18 = vmax.f32 %v48_v10, %v49_v14  ;;  %v56_v19 = vrot.slane %v55_v15, 2  ;;  %v64_v20 = vmax.f32 %v62_v12, %v63_v16  ;;  %v70_v21 = vrot.slane %v69_v17, 2  ;;  %v38_v14 = vld [vmem:[#allocation5] sm:$0xf] }
  0x22   :  { %v456_v16 = vshrl.u32 %v148_v11, 7  ;;  %vm150_vm1 = vcmp.ne.s32.totalorder %v38_v14, 9999  ;;  %vm312_vm6 = vcmp.lt.s32.totalorder %v148_v11, 512 }
  0x23   :  { %v51_v22 = vrot.slane %v50_v18, 1  ;;  %v57_v23 = vmax.f32 %v55_v15, %v56_v19  ;;  %v65_v24 = vrot.slane %v64_v20, 1  ;;  %v71_v25 = vmax.f32 %v69_v17, %v70_v21 }
  0x24   :  { %v162_v21 = vsub.s32 2, %v456_v16 }
  0x25   :  { %v52_v26 = vmax.f32 %v50_v18, %v51_v22  ;;  %v58_v27 = vrot.slane %v57_v23, 1  ;;  %v66_v28 = vmax.f32 %v64_v20, %v65_v24  ;;  %v72_v29 = vrot.slane %v71_v25, 1 }
  0x26   :  { %v154_v18 = vsub.s32 0, %v456_v16  ;;  %v151_v20 = vsel %vm150_vm1, %v38_v14, 0  ;;  %v158_v22 = vsub.s32 1, %v456_v16 }
  0x27   :  { %v59_v30 = vmax.f32 %v57_v23, %v58_v27  ;;  %v73_v31 = vmax.f32 %v71_v25, %v72_v29  ;;  %v166_v23 = vsub.s32 3, %v456_v16  ;;  %v163_v27 = vrot.slane %v151_v20, %v162_v21 }
  0x28   :  { %v155_v25 = vrot.slane %v151_v20, %v154_v18 }
  0x29   :  { %v78_v32 = vcombine.low %v52_v26, %v59_v30  ;;  %v79_v33 = vcombine.low %v66_v28, %v73_v31  ;;  %v159_v28 = vrot.slane %v151_v20, %v158_v22  ;;  %v167_v29 = vrot.slane %v151_v20, %v166_v23 }
  0x2a   :  { %vm168_vm2 = vcmp.eq.s32.totalorder %v155_v25, %v456_v16  ;;  %vm170_vm3 = vcmp.eq.s32.totalorder %v163_v27, %v456_v16 }
  0x2b   :  { %v82_v34 = vsub.f32 %v36_v0, %v78_v32  ;;  %v83_v35 = vsub.f32 %v37_v1, %v79_v33  ;;  %vm169_vm4 = vcmp.eq.s32.totalorder %v159_v28, %v456_v16  ;;  %vm171_vm5 = vcmp.eq.s32.totalorder %v167_v29, %v456_v16 }
  0x2d   :  { %v84_v36 = vmul.f32 1.442695, %v82_v34  ;;  %v86_v37 = vmul.f32 1.442695, %v83_v35 }
  0x2f   :  { %343 = vpow2.f32 %v84_v36  ;;  %v423_v36 = vmov 0.0  }
  0x30   :  { %345 = vpow2.f32 %v86_v37  ;;  %v331_v37 = vsel %vm168_vm2, 1.0, %v423_v36 }
  0x3c   :  { %v344_v38 = vpop.eup %343 }
  0x3d   :  { %v346_v39 = vpop.eup %345  ;;  %v90_v40 = vcombine.high %v344_v38, %v344_v38  ;;  %v94_v41 = vsel %vm45_vm0, %v344_v38, 0.0 }
  0x3e   :  { %v91_v42 = vcombine.high %v346_v39, %v346_v39  ;;  %v95_v43 = vrot.slane %v94_v41, 4  ;;  %v108_v44 = vsel %vm45_vm0, %v346_v39, 0.0 }
  0x3f   :  { %v101_v45 = vsel %vm45_vm0, %v90_v40, 0.0  ;;  %v109_v46 = vrot.slane %v108_v44, 4 }
  0x40   :  { %v96_v47 = vadd.f32 %v95_v43, %v94_v41  ;;  %v102_v48 = vrot.slane %v101_v45, 4  ;;  %v115_v49 = vsel %vm45_vm0, %v91_v42, 0.0  ;;  %v332_v41 = vsel %vm169_vm4, 1.0, %v423_v36 }
  0x41   :  { %v110_v50 = vadd.f32 %v109_v46, %v108_v44  ;;  %v116_v51 = vrot.slane %v115_v49, 4  ;;  %v476_v42 = vsel %vm150_vm1, 1.0, %v423_v36  ;;  %v424_v43 = vmov 1966171168  }
  0x42   :  { %v97_v52 = vrot.slane %v96_v47, 2  ;;  %v103_v53 = vadd.f32 %v102_v48, %v101_v45  ;;  %v478_v44 = vunpack.c.l.s4 %v424_v43  ;;  %v334_v45 = vsel %vm171_vm5, 1.0, %v423_v36 }
  0x43   :  { %v111_v54 = vrot.slane %v110_v50, 2  ;;  %v117_v55 = vadd.f32 %v116_v51, %v115_v49 }
  0x44   :  { %v98_v56 = vadd.f32 %v97_v52, %v96_v47  ;;  %v104_v57 = vrot.slane %v103_v53, 2 }
  0x45   :  { %v112_v58 = vadd.f32 %v111_v54, %v110_v50  ;;  %v118_v59 = vrot.slane %v117_v55, 2 }
  0x46   :  { %v99_v60 = vrot.slane %v98_v56, 1  ;;  %v105_v61 = vadd.f32 %v104_v57, %v103_v53 }
  0x47   :  { %v113_v62 = vrot.slane %v112_v58, 1  ;;  %v119_v63 = vadd.f32 %v118_v59, %v117_v55 }
  0x48   :  { %v100_v0 = vadd.f32 %v99_v60, %v98_v56  ;;  %v106_v1 = vrot.slane %v105_v61, 1 }
  0x49   :  { %v114_v2 = vadd.f32 %v113_v62, %v112_v58  ;;  %v120_v3 = vrot.slane %v119_v63, 1 }
  0x4a   :  { %v107_v4 = vadd.f32 %v106_v1, %v105_v61 }
  0x4b   :  { %v121_v5 = vadd.f32 %v120_v3, %v119_v63 }
  0x4c   :  { %v126_v6 = vcombine.low %v100_v0, %v107_v4 }
  0x4d   :  { %v127_v7 = vcombine.low %v114_v2, %v121_v5 }
  0x4e   :  { %347 = vrcp.f32 %v126_v6 }
  0x4f   :  { %349 = vrcp.f32 %v127_v7 }
  0x5b   :  { %v348_v8 = vpop.eup %347 }
  0x5c   :  { %v350_v9 = vpop.eup %349  ;;  %v131_v10 = vmul.f32 %v348_v8, %v344_v38 }
  0x5d   :  { %v133_v12 = vmul.f32 %v350_v9, %v346_v39  ;;  %v333_v39 = vsel %vm170_vm3, 1.0, %v423_v36 }
  0x5e   :  { %v134_v13 = vadd.f32 1e-08, %v131_v10 }
  0x5f   :  { %v135_v15 = vadd.f32 1e-08, %v133_v12 }
  0x60   :  { %351 = vlog2.f32 %v134_v13  ;;  %v136_v17 = vsub.f32 1.0, %v134_v13 }
  0x61   :  { %353 = vlog2.f32 %v135_v15  ;;  %v137_v19 = vsub.f32 1.0, %v135_v15 }
  0x62   :  { %v138_v24 = vmul.f32 %v136_v17, %v136_v17 }
  0x63   :  { %v139_v26 = vmul.f32 %v137_v19, %v137_v19 }
  0x64   :  { %v140_v30 = vsub.f32 0.0, %v138_v24 }
  0x65   :  { %v141_v32 = vsub.f32 0.0, %v139_v26 }
  0x6d   :  { %v352_v31 = vpop.eup %351 }
  0x6e   :  { %v354_v33 = vpop.eup %353  ;;  %v143_v34 = vmul.f32 0.6931472, %v352_v31 }
  0x6f   :  { %v145_v35 = vmul.f32 0.6931472, %v354_v33 }
  0x70   :  { %v146_v38 = vmul.f32 %v143_v34, %v140_v30 }
  0x71   :  { %v147_v40 = vmul.f32 %v145_v35, %v141_v32 }
  0x72   :  { %v182_v46 = vcombine.high %v146_v38, %v146_v38  ;;  %v186_v47 = vmul.f32 %v331_v37, %v146_v38  ;;  %v218_v48 = vsel %vm45_vm0, %v146_v38, 0.0 }
  0x73   :  { %v183_v49 = vcombine.high %v147_v40, %v147_v40  ;;  %v188_v50 = vmul.f32 %v333_v39, %v147_v40  ;;  %v219_v51 = vrot.slane %v218_v48, 4  ;;  %v232_v52 = vsel %vm45_vm0, %v147_v40, 0.0 }
  0x74   :  { %v187_v53 = vmul.f32 %v332_v41, %v182_v46  ;;  %v190_v54 = vsel %vm45_vm0, %v186_v47, 0.0  ;;  %v225_v55 = vsel %vm45_vm0, %v182_v46, 0.0  ;;  %v233_v56 = vrot.slane %v232_v52, 4 }
  0x75   :  { %v189_v57 = vmul.f32 %v334_v45, %v183_v49  ;;  %v191_v58 = vrot.slane %v190_v54, 4  ;;  %v204_v59 = vsel %vm45_vm0, %v188_v50, 0.0  ;;  %v220_v60 = vadd.f32 %v219_v51, %v218_v48 }
  0x76   :  { %v197_v61 = vsel %vm45_vm0, %v187_v53, 0.0  ;;  %v205_v62 = vrot.slane %v204_v59, 4  ;;  %v226_v63 = vrot.slane %v225_v55, 4  ;;  %v234_v0 = vadd.f32 %v233_v56, %v232_v52 }
  0x77   :  { %v192_v1 = vadd.f32 %v191_v58, %v190_v54  ;;  %v198_v2 = vrot.slane %v197_v61, 4  ;;  %v211_v3 = vsel %vm45_vm0, %v189_v57, 0.0  ;;  %v221_v4 = vrot.slane %v220_v60, 2 }
  0x78   :  { %v206_v5 = vadd.f32 %v205_v62, %v204_v59  ;;  %v212_v6 = vrot.slane %v211_v3, 4  ;;  %v227_v7 = vadd.f32 %v226_v63, %v225_v55  ;;  %v235_v8 = vrot.slane %v234_v0, 2 }
  0x79   :  { %v193_v9 = vrot.slane %v192_v1, 2  ;;  %v199_v10 = vadd.f32 %v198_v2, %v197_v61  ;;  %v222_v12 = vadd.f32 %v221_v4, %v220_v60  ;;  %v239_v13 = vsel %vm45_vm0, %v183_v49, 0.0 }
  0x7a   :  { %v207_v14 = vrot.slane %v206_v5, 2  ;;  %v213_v15 = vadd.f32 %v212_v6, %v211_v3  ;;  %v228_v17 = vrot.slane %v227_v7, 2  ;;  %v236_v19 = vadd.f32 %v235_v8, %v234_v0 }
  0x7b   :  { %v194_v20 = vadd.f32 %v193_v9, %v192_v1  ;;  %v200_v24 = vrot.slane %v199_v10, 2  ;;  %v223_v25 = vrot.slane %v222_v12, 1  ;;  %v240_v26 = vrot.slane %v239_v13, 4 }
  0x7c   :  { %v208_v27 = vadd.f32 %v207_v14, %v206_v5  ;;  %v214_v28 = vrot.slane %v213_v15, 2  ;;  %v229_v29 = vadd.f32 %v228_v17, %v227_v7  ;;  %v237_v30 = vrot.slane %v236_v19, 1 }
  0x7d   :  { %v195_v31 = vrot.slane %v194_v20, 1  ;;  %v201_v32 = vadd.f32 %v200_v24, %v199_v10  ;;  %v224_v33 = vadd.f32 %v223_v25, %v222_v12  ;;  %v241_v34 = vadd.f32 %v240_v26, %v239_v13 }
  0x7e   :  { %v209_v35 = vrot.slane %v208_v27, 1  ;;  %v215_v36 = vadd.f32 %v214_v28, %v213_v15  ;;  %v230_v37 = vrot.slane %v229_v29, 1  ;;  %v238_v38 = vadd.f32 %v237_v30, %v236_v19 }
  0x7f   :  { %v196_v39 = vadd.f32 %v195_v31, %v194_v20  ;;  %v202_v40 = vrot.slane %v201_v32, 1  ;;  %v242_v41 = vrot.slane %v241_v34, 2  ;;  %v246_v43 = vmul.f32 1e-06, %v224_v33 }
  0x80   :  { %v210_v45 = vadd.f32 %v209_v35, %v208_v27  ;;  %v216_v46 = vrot.slane %v215_v36, 1  ;;  %v231_v47 = vadd.f32 %v230_v37, %v229_v29  ;;  %v260_v48 = vrot.slane %v476_v42, %v154_v18 }
  0x81   :  { %v203_v49 = vadd.f32 %v202_v40, %v201_v32  ;;  %v243_v50 = vadd.f32 %v242_v41, %v241_v34  ;;  %v248_v51 = vmul.f32 1e-06, %v238_v38  ;;  %v250_v52 = vadd.f32 %v246_v43, %v196_v39 }
  0x82   :  { %v247_v53 = vmul.f32 1e-06, %v231_v47  ;;  %v264_v54 = vrot.slane %v476_v42, %v158_v22  ;;  %v268_v57 = vrot.slane %v476_v42, %v162_v21  ;;  %v289_v58 = vunpack.c.0.s8 %v478_v44 }
  0x83   :  { %v244_v55 = vrot.slane %v243_v50, 1  ;;  %v217_v59 = vadd.f32 %v216_v46, %v215_v36  ;;  %v252_v18 = vadd.f32 %v248_v51, %v210_v45  ;;  %v277_v61 = vmul.f32 %v260_v48, %v250_v52 }
  0x84   :  { %v251_v56 = vadd.f32 %v247_v53, %v203_v49  ;;  %v272_v0 = vrot.slane %v476_v42, %v166_v23  ;;  %v292_v3 = vsub.s32 %v289_v58, %v456_v16 }
  0x85   :  { %v245_v60 = vadd.f32 %v244_v55, %v243_v50  ;;  %v279_v22 = vmul.f32 %v268_v57, %v252_v18 }
  0x86   :  { %v278_v62 = vmul.f32 %v264_v54, %v251_v56 }
  0x87   :  { %v249_v63 = vmul.f32 1e-06, %v245_v60 }
  0x88   :  { %v285_v2 = vcombine.low %v277_v61, %v278_v62 }
  0x89   :  { %v253_v1 = vadd.f32 %v249_v63, %v217_v59 }
  0x8a   :  { %v293_v21 = vrot.slane %v285_v2, %v292_v3 }
  0x8b   :  { %v280_v4 = vmul.f32 %v272_v0, %v253_v1 }
  0x8d   :  { %v286_v5 = vcombine.low %v279_v22, %v280_v4 }
  0x8f   :  { %v300_v6 = vrot.slane %v286_v5, %v292_v3 }
  0x91   :  { %v301_v44 = vcombine.low %v293_v21, %v300_v6 }
  0x93   :  { %v308_v7 = vrot.slane %v301_v44, %v292_v3 }
  0x95   :  { %314 = vst.msk [vmem:[#allocation7] sm:$0xf] %vm312_vm6, %v308_v7 }
  0x96   :  { %406 = shalt.err (!%p403_p0)
}
  0x97   :  { %324 = dma.vmem_to_hbm [thread:$0]  %s322_s1, 64, %s508_s2, [#allocation4]  }
  0x98   :  { %419 = dma.done.wait [#allocation4], 64  }
  0x99   :  { %420 = vsyncadd [#allocation4], 4294967232 }
  0x9a   :  { %328 = vsyncpa [#allocation3], 1 }
  0x9b   :  { %329 = vsyncpa [#allocation6], 1 }
  0x9c   :  { %330 = vsyncpa [#allocation4], 1 }

</bundles_post_ra>
